<compile_context>
chip_gen: v7x
topology: tpu7x:2x2x1
jax: 0.10.0
libtpu: 0.0.40
codegen_flags: <defaults>
</compile_context>

<pallas_src>
import math

import jax
import jax.numpy as jnp
from jax.experimental import pallas as pl
from jax.experimental.pallas import tpu as pltpu

_LANE = 128


def _round_up(x, m):
    return ((x + m - 1) // m) * m


def _vmem_capacity_bytes():
    """Physical VMEM per core; fall back to 64 MiB (v7x, the smallest)."""
    try:
        cap = int(getattr(pltpu.get_tpu_info(), "vmem_capacity_bytes", 0))
        if cap > 0:
            return cap
    except Exception:
        pass
    return 64 * 1024 * 1024


def _tile_candidates(n_pad):
    cands = [c for c in (2048, 1024, 512, 256, 128)
             if c <= n_pad and n_pad % c == 0]
    return cands if cands else [n_pad]


def _pick_row_tile(n_pad, bytes_per_row, budget):
    """Largest candidate row tile that fits `budget`; prefer grid >= 2."""
    best = None
    for t in _tile_candidates(n_pad):
        if t * bytes_per_row > budget:
            continue
        score = (n_pad // t >= 2, t)
        if best is None or score > best[0]:
            best = (score, t)
    return best[1] if best is not None else _tile_candidates(n_pad)[-1]


def _select_agg_tiles(n_pad, dpad, adj_sz, sup_sz, budget):
    """Pick (tm, tk, support_resident) for the aggregation kernel.

    VMEM model: 2*tm*tk (adjacency double buffer) + support (resident or
    2*tk*dpad tile) + 2*tm*dpad*4 (output double buffer) + tm*dpad*4 (acc).
    Prefer a row-grid extent >= 2 (megacore), then the largest tiles.
    """
    cands = _tile_candidates(n_pad)
    support_bytes = n_pad * dpad * sup_sz
    support_resident = support_bytes <= budget // 4
    best = None
    for tm in cands:
        for tk in cands:
            adj_buf = 2 * tm * tk * adj_sz
            sup_buf = support_bytes if support_resident else 2 * tk * dpad * sup_sz
            out_buf = 2 * tm * dpad * 4
            acc_buf = tm * dpad * 4
            total = adj_buf + sup_buf + out_buf + acc_buf + 2 * dpad * 4
            if total > budget:
                continue
            score = (n_pad // tm >= 2, tm * tk, tk)
            if best is None or score > best[0]:
                best = (score, tm, tk)
    if best is None:
        return cands[-1], cands[-1], False
    return best[1], best[2], support_resident


# ---------------------------------------------------------------------------
# Kernel 1: support = X @ W_pad   (computed once, outside the A-contraction)
# ---------------------------------------------------------------------------
def _support_kernel(x_ref, w_ref, sup_ref):
    sup_ref[...] = jnp.dot(
        x_ref[...], w_ref[...], preferred_element_type=jnp.float32
    ).astype(sup_ref.dtype)


def _compute_support(x, w_pad, tm):
    n_pad, din = x.shape
    dpad = w_pad.shape[1]
    sz = x.dtype.itemsize
    return pl.pallas_call(
        _support_kernel,
        out_shape=jax.ShapeDtypeStruct((n_pad, dpad), x.dtype),
        grid_spec=pltpu.PrefetchScalarGridSpec(
            num_scalar_prefetch=0,
            grid=(n_pad // tm,),
            in_specs=[
                pl.BlockSpec((tm, din), lambda i: (i, 0)),
                pl.BlockSpec((din, dpad), lambda i: (0, 0)),
            ],
            out_specs=pl.BlockSpec((tm, dpad), lambda i: (i, 0)),
        ),
        compiler_params=pltpu.CompilerParams(
            dimension_semantics=("parallel",),
        ),
        cost_estimate=pl.CostEstimate(
            flops=2 * n_pad * din * dpad,
            transcendentals=0,
            bytes_accessed=sz * (n_pad * din + din * dpad + n_pad * dpad),
        ),
    )(x, w_pad)


# ---------------------------------------------------------------------------
# Kernel 2: out = A @ support + bias   (tiled, accumulated in f32 VMEM)
# ---------------------------------------------------------------------------
def _make_aggregate_kernel(tk, support_resident):
    def kernel(adj_ref, sup_ref, b_ref, out_ref, acc_ref):
        k = pl.program_id(1)
        if support_resident:
            start = pl.multiple_of(k * tk, tk)
            sup = sup_ref[pl.ds(start, tk), :]     # slice the resident slab
        else:
            sup = sup_ref[...]
        contrib = jnp.dot(adj_ref[...], sup, preferred_element_type=jnp.float32)

        @pl.when(k == 0)
        def _():
            acc_ref[...] = contrib                 # direct write, no zero-init

        @pl.when(k > 0)
        def _():
            acc_ref[...] += contrib

        @pl.when(k == pl.num_programs(1) - 1)
        def _():
            # bias broadcast + store only in the finalize branch (lane-dense)
            out_ref[...] = (acc_ref[...] + b_ref[...]).astype(out_ref.dtype)

    return kernel


def graph_convolution(adjacency, x, weight, bias=None, *,
                      input_dtype=jnp.bfloat16):
    """GCN layer forward: adjacency @ (x @ weight) + bias.

    adjacency: (N, N) dense normalized adjacency, x: (N, Din),
    weight: (Din, Dout), bias: (Dout,) or None.  Returns (N, Dout) f32.

    `input_dtype` (default bf16) is the streaming dtype for adjacency / x /
    support — it halves the dominant N^2 adjacency HBM read vs f32; matmul
    accumulation is always f32.  Pass jnp.float32 for exact f32 semantics.
    """
    input_dtype = jnp.dtype(input_dtype)
    adjacency = jnp.asarray(adjacency)
    x = jnp.asarray(x)
    weight = jnp.asarray(weight, jnp.float32)

    n = adjacency.shape[0]
    din, dout = weight.shape
    dpad = _round_up(dout, _LANE)     # lane-dense output-feature axis
    n_pad = _round_up(n, _LANE)       # (8,128)-aligned node axis

    # zero-pad weight / bias along the output-feature axis
    w_pad = jnp.zeros((din, dpad), jnp.float32).at[:, :dout].set(weight)
    if bias is None:
        b_pad = jnp.zeros((1, dpad), jnp.float32)
    else:
        b_pad = jnp.zeros((1, dpad), jnp.float32).at[:, :dout].set(
            jnp.asarray(bias, jnp.float32).reshape(1, dout))

    # cast the streamed operands + zero-pad the node axis
    adjacency = adjacency.astype(input_dtype)
    x = x.astype(input_dtype)
    if n_pad != n:
        adjacency = jnp.pad(adjacency, ((0, n_pad - n), (0, n_pad - n)))
        x = jnp.pad(x, ((0, n_pad - n), (0, 0)))

    adj_sz = input_dtype.itemsize
    sup_sz = input_dtype.itemsize

    vmem_cap = _vmem_capacity_bytes()
    vmem_limit = min((vmem_cap * 3) // 4, 100 * 1024 * 1024)
    budget = vmem_limit - (2 << 20)    # headroom for compiler-internal scratch

    # --- support = X @ W (hoisted; computed exactly once) ----------------
    sup_row_bytes = 2 * din * adj_sz + 2 * dpad * sup_sz
    tms = _pick_row_tile(n_pad, sup_row_bytes, budget - din * dpad * sup_sz)
    support = _compute_support(x, w_pad.astype(input_dtype), tms)

    # --- out = A @ support + bias ----------------------------------------
    tm, tk, support_resident = _select_agg_tiles(
        n_pad, dpad, adj_sz, sup_sz, budget)
    grid = (n_pad // tm, n_pad // tk)

    if support_resident:
        # constant block index -> DMA'd once, stays resident for the call
        sup_spec = pl.BlockSpec((n_pad, dpad), lambda i, k: (0, 0))
    else:
        sup_spec = pl.BlockSpec((tk, dpad), lambda i, k: (k, 0))

    # TODO(synk): if a profile shows exposed adjacency DMA, add
    # pipeline_mode=pl.Buffered(3) on the adjacency BlockSpec (re-check the
    # v7x VMEM budget first).
    out_pad = pl.pallas_call(
        _make_aggregate_kernel(tk, support_resident),
        out_shape=jax.ShapeDtypeStruct((n_pad, dpad), jnp.float32),
        grid_spec=pltpu.PrefetchScalarGridSpec(
            num_scalar_prefetch=0,
            grid=grid,
            in_specs=[
                pl.BlockSpec((tm, tk), lambda i, k: (i, k)),    # adjacency tile
                sup_spec,                                       # support
                pl.BlockSpec((1, dpad), lambda i, k: (0, 0)),   # bias (DMA once)
            ],
            out_specs=pl.BlockSpec((tm, dpad), lambda i, k: (i, 0)),
            scratch_shapes=[pltpu.VMEM((tm, dpad), jnp.float32)],
        ),
        compiler_params=pltpu.CompilerParams(
            dimension_semantics=("parallel", "arbitrary"),
            vmem_limit_bytes=int(vmem_limit),
        ),
        cost_estimate=pl.CostEstimate(
            flops=2 * n_pad * n_pad * dpad,
            transcendentals=0,
            bytes_accessed=(adj_sz * n_pad * n_pad
                            + sup_sz * n_pad * dpad
                              * (1 if support_resident else n_pad // tm)
                            + 4 * n_pad * dpad),
        ),
    )(adjacency, support, b_pad)

    return out_pad[:n, :dout]


# ---------------------------------------------------------------------------
# Parameter / input construction (training-side helpers, not the kernel)
# ---------------------------------------------------------------------------
def make_params(key, input_dim, output_dim, use_bias=True):
    """Mirror of reset_parameters(): kaiming_uniform_ on an (in, out) weight.

    PyTorch kaiming_uniform_ defaults: gain = sqrt(2),
    fan_in = weight.size(1) = output_dim, bound = gain * sqrt(3 / fan_in).
    """
    bound = math.sqrt(2.0) * math.sqrt(3.0 / output_dim)
    weight = jax.random.uniform(
        key, (input_dim, output_dim), jnp.float32, minval=-bound, maxval=bound)
    bias = jnp.zeros((output_dim,), jnp.float32) if use_bias else None
    return weight, bias


def make_normalized_adjacency(key, n):
    """Small random symmetric graph -> D^-1/2 (A+I) D^-1/2 (densified)."""
    a = (jax.random.uniform(key, (n, n)) > 0.8).astype(jnp.float32)
    a = jnp.maximum(a, a.T)                       # symmetric
    a = a + jnp.eye(n, dtype=jnp.float32)         # self loops
    deg = jnp.sum(a, axis=1)
    d_inv_sqrt = 1.0 / jnp.sqrt(deg)
    return a * d_inv_sqrt[:, None] * d_inv_sqrt[None, :]


if __name__ == "__main__":
    # N deliberately NOT a multiple of 128 to exercise the padding path.
    N, INPUT_DIM, OUTPUT_DIM = 200, 32, 16

    key = jax.random.PRNGKey(0)
    k_adj, k_x, k_w = jax.random.split(key, 3)

    adjacency = make_normalized_adjacency(k_adj, N)
    x = jax.random.normal(k_x, (N, INPUT_DIM), jnp.float32)
    weight, bias = make_params(k_w, INPUT_DIM, OUTPUT_DIM, use_bias=True)

    ref = adjacency @ (x @ weight) + bias.reshape(1, -1)

    # Default (bf16-streaming) path: f32 accumulate, loose tolerance vs f32 ref.
    out_bf16 = jax.block_until_ready(graph_convolution(adjacency, x, weight, bias))
    assert out_bf16.shape == (N, OUTPUT_DIM)
    assert jnp.allclose(out_bf16, ref, atol=5e-2, rtol=5e-2), float(
        jnp.max(jnp.abs(out_bf16 - ref)))

    # Bit-faithful f32 path: tight tolerance.
    out_f32 = jax.block_until_ready(
        graph_convolution(adjacency, x, weight, bias, input_dtype=jnp.float32))
    assert out_f32.shape == (N, OUTPUT_DIM)
    assert jnp.allclose(out_f32, ref, atol=1e-3, rtol=1e-3), float(
        jnp.max(jnp.abs(out_f32 - ref)))

    print("KERNEL_OK")
</pallas_src>

<mosaic_0001>
module attributes {stable_mosaic.version = 11 : i64} {
  func.func @_support_kernel(%arg0: i32, %arg1: memref<128x32xbf16, #tpu.memory_space<vmem>>, %arg2: memref<32x128xbf16, #tpu.memory_space<vmem>>, %arg3: memref<128x128xbf16, #tpu.memory_space<vmem>>) attributes {dimension_semantics = [#tpu.dimension_semantics<parallel>], iteration_bounds = array<i64: 2>, scalar_prefetch = 0 : i64, scratch_operands = 0 : i64, tpu.core_type = #tpu.core_type<tc>, window_params = [{transform_indices = @transform_0, window_bounds = array<i64: 128, 32>}, {pipeline_mode = #tpu.pipeline_mode<synchronous>, transform_indices = @transform_1, window_bounds = array<i64: 32, 128>}, {transform_indices = @transform_2, window_bounds = array<i64: 128, 128>}]} {
    %c0 = arith.constant 0 : index
    %c0_0 = arith.constant 0 : index
    %0 = vector.load %arg1[%c0, %c0_0] : memref<128x32xbf16, #tpu.memory_space<vmem>>, vector<128x32xbf16>
    %c0_1 = arith.constant 0 : index
    %c0_2 = arith.constant 0 : index
    %1 = vector.load %arg2[%c0_1, %c0_2] : memref<32x128xbf16, #tpu.memory_space<vmem>>, vector<32x128xbf16>
    %cst = arith.constant dense<0.000000e+00> : vector<128x128xf32>
    %2 = tpu.matmul %0, %1, %cst {dimension_numbers = #tpu.dot_dimension_numbers<[1], [0], [0], [1], [0, 0, 1, 1], [], []>} : vector<128x32xbf16>, vector<32x128xbf16>, vector<128x128xf32> -> vector<128x128xf32>
    %3 = arith.truncf %2 : vector<128x128xf32> to vector<128x128xbf16>
    %c0_3 = arith.constant 0 : index
    %c0_4 = arith.constant 0 : index
    %4 = vector.load %arg3[%c0_3, %c0_4] : memref<128x128xbf16, #tpu.memory_space<vmem>>, vector<128x128xbf16>
    tpu.vector_store %arg3[%c0_3, %c0_4], %3 {strides = array<i32>} : memref<128x128xbf16, #tpu.memory_space<vmem>>, vector<128x128xbf16>,
    return
  }
  func.func @transform_0(%arg0: i32) -> (i32, i32) {
    %c0_i32 = arith.constant 0 : i32
    %c0_i32_0 = arith.constant 0 : i32
    return %arg0, %c0_i32 : i32, i32
  }
  func.func @transform_1(%arg0: i32) -> (i32, i32) {
    %c0_i32 = arith.constant 0 : i32
    %c0_i32_0 = arith.constant 0 : i32
    %c0_i32_1 = arith.constant 0 : i32
    return %c0_i32, %c0_i32_0 : i32, i32
  }
  func.func @transform_2(%arg0: i32) -> (i32, i32) {
    %c0_i32 = arith.constant 0 : i32
    %c0_i32_0 = arith.constant 0 : i32
    return %arg0, %c0_i32 : i32, i32
  }
}

</mosaic_0001>

<bundles_post_ra>
// kernel: tpu_custom_call.1
= control target key start
LH: loop header
LB: loop body
LE: loop exit
PB: predicated region body
PF: predicated region fallthrough
CT: control target
= control target key end

     0   :  { %7 = vsyncpa [#allocation3], 0  ;;  %s893_s0 = inlined_call_operand.vmem [shape: bf16[256,32], index: 0, kind: input, shape index: {}]   ;;  %s894_s1 = inlined_call_operand.vmem [shape: bf16[32,128], index: 1, kind: input, shape index: {}]   ;;  %s895_s2 = inlined_call_operand.hbm [shape: bf16[256,128], index: 2, kind: output, shape index: {}]  }
   0x1   :  { %9 = vsyncpa [#allocation3 + $0x1], 0  ;;  %s773_s9 = smov 0   ;;  %s775_s10 = smov 0  }
   0x2   :  { %s777_s11 = smov 0   ;;  %s779_s12 = smov 0  }
   0x3 LB: > { %s794_s13 = sadd.s32 4294967295, %s753_s12   ;;  %s496_s14 = sadd.s32 4294967294, %s753_s12   ;;  %s753_s12 = sphi %s779_s12, %s901_s12   ;;  %s749_s11 = sphi %s777_s11, %s900_s11   ;;  %s745_s10 = sphi %s775_s10, %s899_s10   ;;  %s741_s9 = sphi %s773_s9, %s898_s9  }
   0x4   : > { %s798_s15 = sadd.s32 1, %s753_s12   ;;  %s69_s16 = sadd.s32 1, %s749_s11 }
   0x5   : > { %s66_s17 = ssub.s32 %s753_s12, %s798_s15  ;;  %p79_p0 = scmp.ne.s32.totalorder %s749_s11, %s745_s10 }
   0x6   : > { %p67_p1 = scmp.eq.s32.totalorder %s66_s17, 0  ;;  %p80_p2 = scmp.eq.s32.totalorder %s794_s13, 1 }
   0x7   : > { %p85_p3 = scmp.ne.s32.totalorder %s745_s10, %s741_s9  ;;  %p86_p4 = scmp.eq.s32.totalorder %s496_s14, 1 }
   0x8   : > { %s809_s18 = scalar_select %p67_p1, %s749_s11, %s69_s16  }
   0x9   : > { %p811_p5 = por %p80_p2, %p79_p0  ;;  %p815_p6 = por %p86_p4, %p85_p3 }
   0xa   : > { %p499_p7 = scmp.ge.s32.totalorder %s753_s12, 1  ;;  %p116_p8 = scmp.lt.s32.totalorder %s753_s12, 3 }
   0xc   : > { %p117_p9 = pnand %p499_p7, %p116_p8 }
   0xd   : > { %v681_v0 = vld [vmem:[%s894_s1] sm:$0xff] (!%p117_p9)   ;;  %s501_s23 = sshll.u32 (!%p117_p9), %s794_s13, 4  ;;  %v682_v1 = vld [vmem:[%s894_s1 + $0x8] sm:$0xff] (!%p117_p9)   ;;  %vm218_vm0 = vcmask (!%p117_p9), 261120   ;;  %s135_s30 = sand.u32 (!%p117_p9), 1, %s745_s10  }
   0xe   : > { %120 = sbr.rel (%p117_p9) target bundleno = 267 (0x10b), region = 28  ;;  %p139_p10 = scmp.lt.s32.totalorder (!%p117_p9), %s501_s23, 31  ;;  %616 = vmatprep.subr.bf16.mxu0 (!%p117_p9), %v681_v0  ;;  %636 = vmatprep.subr.bf16.mxu1 (!%p117_p9), %v681_v0 }
   0xf   : > { %617 = vmatpush3.bf16.msra.mxu0 (!%p117_p9), %v681_v0  ;;  %638 = vmatpush3.bf16.msra.mxu1 (!%p117_p9), %v681_v0  ;;  %s500_s3 = sshll.u32 (!%p117_p9), %s135_s30, 6  ;;  %s558_s5 = sshll.u32 (!%p117_p9), %s794_s13, 10 }
  0x10   : > { %618 = vmatprep.subr.bf16.mxu0 (!%p117_p9), %v682_v1  ;;  %637 = vmatprep.subr.bf16.mxu1 (!%p117_p9), %v682_v1  ;;  %s137_s4 = scalar_lea.vmem (!%p117_p9), [#allocation2], %s500_s3  ;;  %s846_s14 = scalar_lea.hbm (!%p117_p9), %s895_s2, %s558_s5 }
  0x11   : > { %s434_s6 = sshll.u32 (!%p117_p9), %s137_s4, 4  ;;  %s852_s13 = scalar_lea.sflag (!%p117_p9), [#allocation3], %s135_s30  ;;  %s848_s6 = int_to_ptr.vmem [resolvable:$true] %s434_s6 }
  0x12   : > { %s691_s16 = scalar_lea.vmem (!%p117_p9), %s848_s6, 1024  ;;  %s755_s17 = smov (!%p117_p9), [#allocation2]  }
  0x13   : > { %619 = vmatpush3.bf16.msra.mxu0 (!%p117_p9), %v682_v1  ;;  %639 = vmatpush3.bf16.msra.mxu1 (!%p117_p9), %v682_v1  ;;  %p692_p11 = scmp.ne.s32.totalorder (!%p117_p9), %s848_s6, %s691_s16  ;;  %s695_s21 = sshll.u32 (!%p117_p9), %s755_s17, 4  ;;  %s696_s21 = int_to_ptr.vmem [resolvable:$false] %s695_s21 }
  0x14   : > { %s697_s22 = scalar_lea.vmem (!%p117_p9), %s696_s21, 2048  ;;  %p698_p0 = scmp.lt.s32.totalorder (!%p117_p9), %s848_s6, %s696_s21 }
  0x15   : > { %s903_s23 = smov (!%p139_p10, %s501_s23), 31  ;;  %p693_p12 = pnand %p692_p11, %p811_p5 }
  0x16   : > { %s502_s26 = sshll.u32 %s903_s23, 2  ;;  %p699_p1 = scmp.lt.s32.totalorder %s697_s22, %s691_s16 }
  0x17   : > { %s142_s29 = scalar_lea.vmem %s893_s0, %s502_s26  ;;  %p694_p13 = pneg %p693_p12 }
  0x18   : > { %v683_v2 = vld [vmem:[%s142_s29] sm:$0xff]   ;;  %v685_v4 = vld [vmem:[%s142_s29 + $0x8] sm:$0xff]   ;;  %v687_v6 = vld [vmem:[%s142_s29 + $0x10] sm:$0xff]   ;;  %p700_p2 = por %p699_p1, %p698_p0 }
  0x19   : > { %v684_v3 = vld [vmem:[%s142_s29 + $0x20] sm:$0xff]   ;;  %620 = vmatprep.mubr.msk.bf16.mxu0 %vm218_vm0, %v683_v2  ;;  %v686_v5 = vld [vmem:[%s142_s29 + $0x28] sm:$0xff]   ;;  %v688_v7 = vld [vmem:[%s142_s29 + $0x30] sm:$0xff]  }
  0x1a   : > { %628 = vmatprep.mubr.msk.bf16.mxu1 %vm218_vm0, %v684_v3  ;;  %621 = vmatmul.mubr.msk.bf16.vlgmr.msra.gmra.mrb[0].mxu0 %vm218_vm0, %v685_v4  ;;  %v689_v8 = vld [vmem:[%s142_s29 + $0x18] sm:$0xff]   ;;  %p701_p3 = pnand %p700_p2, %p694_p13 }
  0x1b   : > { %629 = vmatmul.mubr.msk.bf16.vlgmr.msra.gmra.mrb[0].mxu1 %vm218_vm0, %v686_v5  ;;  %624 = vmatprep.mubr.msk.bf16.mxu0 %vm218_vm0, %v687_v6  ;;  %v690_v9 = vld [vmem:[%s142_s29 + $0x38] sm:$0xff]  }
  0x1c   : > { %632 = vmatprep.mubr.msk.bf16.mxu1 %vm218_vm0, %v688_v7 }
  0x22   : > { %625 = vmatmul.mubr.msk.bf16.gmra.mrb[4].mxu0 %vm218_vm0, %v689_v8 }
  0x23   : > { %633 = vmatmul.mubr.msk.bf16.gmra.mrb[4].mxu1 %vm218_vm0, %v690_v9 }
  0xed   : > { %v622_v10 = vpop.f32.mrb[0].mxu0 }
  0xee   : > { %v630_v11 = vpop.f32.mrb[0].mxu1  ;;  %v277_v12 = vpop.f32.mrb[1].mxu0 }
  0xef   : > { %v309_v13 = vpop.f32.mrb[1].mxu1  ;;  %v623_v14 = vpop.f32.mrb[2].mxu0 }
  0xf0   : > { %v567_v15 = vpack.c.bf16 %v623_v14, %v622_v10  ;;  %v631_v16 = vpop.f32.mrb[2].mxu1  ;;  %v280_v17 = vpop.f32.mrb[3].mxu0 }
  0xf1   : > { %v587_v18 = vpack.c.bf16 %v631_v16, %v630_v11  ;;  %v562_v19 = vpack.c.bf16 %v280_v17, %v277_v12  ;;  %v312_v20 = vpop.f32.mrb[3].mxu1 }
  0xf2   : > { %599 = vst [vmem:[%s137_s4 + $0x8] sm:$0xff] %v567_v15   ;;  %v582_v21 = vpack.c.bf16 %v312_v20, %v309_v13 }
  0xf3   : > { %603 = vst [vmem:[%s137_s4 + $0x28] sm:$0xff] %v587_v18   ;;  %563 = vst [vmem:[%s137_s4] sm:$0xff] %v562_v19  }
  0xf4   : > { %602 = vst [vmem:[%s137_s4 + $0x20] sm:$0xff] %v582_v21  }
  0xf5   : > { %v626_v22 = vpop.f32.mrb[4].mxu0 }
  0xf6   : > { %v634_v23 = vpop.f32.mrb[4].mxu1  ;;  %v293_v24 = vpop.f32.mrb[5].mxu0 }
  0xf7   : > { %v325_v25 = vpop.f32.mrb[5].mxu1  ;;  %v627_v26 = vpop.f32.mrb[6].mxu0 }
  0xf8   : > { %v577_v27 = vpack.c.bf16 %v627_v26, %v626_v22  ;;  %v635_v28 = vpop.f32.mrb[6].mxu1  ;;  %v296_v29 = vpop.f32.mrb[7].mxu0 }
  0xf9   : > { %v597_v30 = vpack.c.bf16 %v635_v28, %v634_v23  ;;  %v572_v31 = vpack.c.bf16 %v296_v29, %v293_v24  ;;  %v328_v32 = vpop.f32.mrb[7].mxu1 }
  0xfa   : > { %601 = vst [vmem:[%s137_s4 + $0x18] sm:$0xff] %v577_v27   ;;  %v592_v33 = vpack.c.bf16 %v328_v32, %v325_v25 }
  0xfb   : > { %605 = vst [vmem:[%s137_s4 + $0x38] sm:$0xff] %v597_v30   ;;  %600 = vst [vmem:[%s137_s4 + $0x10] sm:$0xff] %v572_v31  }
  0xfc   : > { %604 = vst [vmem:[%s137_s4 + $0x30] sm:$0xff] %v592_v33  }
  0xfd   : > { %704 = shalt.err (!%p701_p3)
}
  0xfe   : > { %s705_s23 = scalar_lea.hbm %s846_s14, 1024  ;;  %s709_s26 = scalar_lea.hbm %s895_s2, 2048 }
  0xff   : > { %p706_p4 = scmp.ne.s32.totalorder %s846_s14, %s705_s23  ;;  %p710_p9 = scmp.lt.u32.totalorder %s846_s14, %s895_s2 }
 0x100   : > { %p711_p10 = scmp.lt.u32.totalorder %s709_s26, %s705_s23  ;;  %p713_p12 = scmp.lt.u32.totalorder %s705_s23, %s846_s14 }
 0x101   : > { %p707_p7 = pnand %p706_p4, %p811_p5 }
 0x102   : > { %p712_p11 = por %p711_p10, %p710_p9 }
 0x103   : > { %p708_p8 = pneg %p707_p7 }
 0x104   : > { %p714_p13 = por %p713_p12, %p712_p11 }
 0x106   : > { %p715_p0 = pnand %p714_p13, %p708_p8 }
 0x108   : > { %718 = shalt.err (!%p715_p0)
}
 0x109   : > { %s756_s29 = smov 64   ;;  %s757_s30 = smov 4  }
 0x10a   : > { %640 = dma.vmem_to_hbm [thread:$0]  (%p811_p5), %s848_s6, 1024, %s846_s14, %s852_s13, %s756_s29, %s756_s29, %s757_s30  }
 0x10b PF: > { %p646_p1 = scmp.ge.s32.totalorder %s753_s12, 2  ;;  %s449_s3 = sand.u32 1, %s741_s9  }
 0x10c   : > { %s450_s4 = scalar_lea.sflag [#allocation3], %s449_s3 }
 0x10d   : > { %p643_p2 = pnand %p646_p1, %p815_p6 }
 0x10f   : > { %736 = dma.done.wait (!%p643_p2), %s450_s4, 1024  }
 0x110   : > { %738 = vsyncadd (!%p643_p2), %s450_s4, 4294966272  ;;  %p12_p3 = scmp.ge.s32.totalorder %s798_s15, 4   ;;  %s898_s9 = smov %s745_s10 }
 0x111   : > { %s899_s10 = smov %s749_s11  ;;  %s900_s11 = smov %s809_s18 }
 0x112   : > { %s901_s12 = smov %s798_s15  ;;  %14 = sbr.rel (!%p12_p3) target bundleno = 3 (0x3), region = 63 }
 0x119   :  { %455 = vsyncpa [#allocation3], 1 }
 0x11a   :  { %457 = vsyncpa [#allocation3 + $0x1], 1 }

</bundles_post_ra>
